<compile_context>
chip_gen: v6e
topology: v6e:2x2x1
jax: 0.10.0
libtpu: 0.0.40
codegen_flags: <defaults>
</compile_context>

<pallas_src>
import jax
import jax.numpy as jnp
from jax.experimental import pallas as pl
from jax.experimental.pallas import tpu as pltpu


# ----------------------------- kernels ------------------------------------ #

def _decoder_kernel_single_k(x_ref, w_ref, b_ref, o_ref):
    # Whole reduction in one tile: dot + bias + ReLU, store directly.
    acc = jnp.dot(x_ref[...], w_ref[...], preferred_element_type=jnp.float32)
    o_ref[...] = jnp.maximum(acc + b_ref[...], 0.0).astype(o_ref.dtype)


def _decoder_kernel_multi_k(x_ref, w_ref, b_ref, o_ref, acc_ref):
    # K-tiled reduction with an f32 VMEM accumulator (k is the innermost axis).
    k = pl.program_id(2)

    @pl.when(k == 0)
    def _init():
        acc_ref[...] = jnp.zeros_like(acc_ref)

    acc_ref[...] += jnp.dot(
        x_ref[...], w_ref[...], preferred_element_type=jnp.float32
    )

    @pl.when(k == pl.num_programs(2) - 1)
    def _finalize():
        o_ref[...] = jnp.maximum(
            acc_ref[...] + b_ref[...], 0.0
        ).astype(o_ref.dtype)


# ----------------------------- helpers ------------------------------------ #

def _cdiv(a, b):
    return (a + b - 1) // b


def _round_up(x, m):
    return ((x + m - 1) // m) * m


def prepare_decoder_weights(w, b, *, tk=None, tk_cap=2048,
                            compute_dtype=jnp.bfloat16):
    """Cast/pad the Linear parameters once (hoist out of the forward loop).

    w: (H, O)  -- transpose of PyTorch nn.Linear's (O, H) weight.
    b: (O,)
    Returns (wp, bp, tk) where wp is bf16 and K-padded to a multiple of tk
    (only if needed), bp is f32 of shape (1, O).
    """
    H, O = w.shape
    assert b.shape == (O,)
    if tk is None:
        # Single K step whenever the whole reduction fits a reasonable tile.
        tk = H if H <= tk_cap else tk_cap
    Kp = _round_up(H, tk)
    wc = w.astype(compute_dtype)
    if Kp != H:
        wp = jnp.zeros((Kp, O), compute_dtype).at[:H, :].set(wc)
    else:
        wp = wc
    bp = b.astype(jnp.float32).reshape(1, O)
    return wp, bp, tk


# ----------------------------- wrapper ------------------------------------ #

def decoder_block_apply(x, wp, bp, tk, *, tm=512, tn=512, out_dtype=None):
    """relu(x @ wp + bp) with pre-prepared (bf16, K-padded) weights."""
    B, H = x.shape
    Kp, O = wp.shape
    assert Kp % tk == 0 and Kp >= H
    assert bp.shape == (1, O)
    compute_dtype = wp.dtype
    out_dtype = out_dtype or x.dtype

    # Only K needs padding (so accumulation over pad columns is inert);
    # M/N edge blocks are handled by Pallas' masked partial-block machinery.
    xc = x.astype(compute_dtype)
    if Kp != H:
        xc = jnp.zeros((B, Kp), compute_dtype).at[:, :H].set(xc)

    # Tile clamps: tm multiple of 16 (bf16 sublane packing), tn multiple of 128
    # (lane-dense stores).
    tm = min(tm, _round_up(B, 16))
    tn = min(tn, _round_up(O, 128))

    # v7x megacore: make sure the product of the two "parallel" axes is >= 2
    # whenever the problem allows, so both TensorCores get work.
    if _cdiv(B, tm) * _cdiv(O, tn) < 2:
        if O > 128:
            tn = _round_up(_cdiv(O, 2), 128)
        elif B > 16:
            tm = _round_up(_cdiv(B, 2), 16)

    gm, gn, gk = _cdiv(B, tm), _cdiv(O, tn), Kp // tk

    c_size = jnp.dtype(compute_dtype).itemsize
    o_size = jnp.dtype(out_dtype).itemsize

    # Footprint-derived scoped-VMEM limit (double-buffered in/out + f32 acc),
    # with headroom, kept under ~48 MiB so the same config fits v7x's 64 MiB.
    tile_bytes = (
        2 * (tm * tk * c_size + tk * tn * c_size + tn * 4 + tm * tn * o_size)
        + tm * tn * 4
    )
    vmem_limit = min(max(tile_bytes + (8 << 20), 16 << 20), 48 << 20)

    # CostEstimate including re-streaming: x is read gn times, w is read gm times.
    flops = 2 * B * O * Kp
    bytes_accessed = (
        gn * xc.size * c_size
        + gm * wp.size * c_size
        + bp.size * 4
        + B * O * o_size
    )
    cost = pl.CostEstimate(
        flops=flops, transcendentals=0, bytes_accessed=bytes_accessed
    )

    if gk == 1:
        # Fast path: no accumulator scratch, purely parallel 2-D grid.
        return pl.pallas_call(
            _decoder_kernel_single_k,
            out_shape=jax.ShapeDtypeStruct((B, O), out_dtype),
            grid=(gm, gn),
            in_specs=[
                pl.BlockSpec((tm, tk), lambda i, j: (i, 0)),
                pl.BlockSpec((tk, tn), lambda i, j: (0, j)),
                pl.BlockSpec((1, tn), lambda i, j: (0, j)),
            ],
            out_specs=pl.BlockSpec((tm, tn), lambda i, j: (i, j)),
            compiler_params=pltpu.CompilerParams(
                dimension_semantics=("parallel", "parallel"),
                vmem_limit_bytes=vmem_limit,
            ),
            cost_estimate=cost,
        )(xc, wp, bp)

    # Multi-K path: f32 VMEM accumulator, k innermost ("arbitrary").
    # TODO(synk): if an xprof trace shows exposed DMA on the weight stream on
    # v7x, add pipeline_mode=pl.Buffered(3) to the weight BlockSpec only.
    return pl.pallas_call(
        _decoder_kernel_multi_k,
        out_shape=jax.ShapeDtypeStruct((B, O), out_dtype),
        grid=(gm, gn, gk),
        in_specs=[
            pl.BlockSpec((tm, tk), lambda i, j, k: (i, k)),
            pl.BlockSpec((tk, tn), lambda i, j, k: (k, j)),
            pl.BlockSpec((1, tn), lambda i, j, k: (0, j)),
        ],
        out_specs=pl.BlockSpec((tm, tn), lambda i, j, k: (i, j)),
        scratch_shapes=[pltpu.VMEM((tm, tn), jnp.float32)],
        compiler_params=pltpu.CompilerParams(
            dimension_semantics=("parallel", "parallel", "arbitrary"),
            vmem_limit_bytes=vmem_limit,
        ),
        cost_estimate=cost,
    )(xc, wp, bp)


def decoder_block(x, w, b, *, tk=None, tm=512, tn=512,
                  compute_dtype=jnp.bfloat16):
    """One-shot convenience: relu(x @ w + b) with w of shape (H, O) = W.T.

    For repeated forward calls, hoist prepare_decoder_weights() out of the
    loop and call decoder_block_apply() directly."""
    wp, bp, tk = prepare_decoder_weights(
        w, b, tk=tk, compute_dtype=compute_dtype
    )
    return decoder_block_apply(x, wp, bp, tk, tm=tm, tn=tn)


# ------------------------------- main -------------------------------------- #

if __name__ == "__main__":
    key = jax.random.PRNGKey(0)
    ks = jax.random.split(key, 9)

    # --- Case 1: DecoderBlock(code, hidden=32, output=16), batch=8 (fast path)
    B, H, O = 8, 32, 16
    x = jax.random.normal(ks[0], (B, H), dtype=jnp.float32)
    w = jax.random.normal(ks[1], (H, O), dtype=jnp.float32) * 0.1   # (H, O) = W.T
    b = jax.random.normal(ks[2], (O,), dtype=jnp.float32) * 0.1

    out = jax.block_until_ready(decoder_block(x, w, b))
    assert out.shape == (B, O)
    ref_bf16 = jnp.maximum(
        jnp.dot(x.astype(jnp.bfloat16), w.astype(jnp.bfloat16),
                preferred_element_type=jnp.float32) + b, 0.0)
    assert jnp.allclose(out, ref_bf16, atol=1e-3, rtol=1e-3)
    # Loose sanity vs full-f32 math (inputs are bf16 on the MXU).
    assert jnp.allclose(out, jnp.maximum(x @ w + b, 0.0), atol=5e-2, rtol=5e-2)

    # --- Case 2: larger single-K fast path; exercises the megacore split ----
    B2, H2, O2 = 192, 384, 256
    x2 = jax.random.normal(ks[3], (B2, H2), dtype=jnp.float32)
    w2 = jax.random.normal(ks[4], (H2, O2), dtype=jnp.float32) * 0.05
    b2 = jax.random.normal(ks[5], (O2,), dtype=jnp.float32) * 0.05

    wp2, bp2, tk2 = prepare_decoder_weights(w2, b2)        # tk2 = H2, gk = 1
    out2 = jax.block_until_ready(decoder_block_apply(x2, wp2, bp2, tk2))
    assert out2.shape == (B2, O2)
    ref2 = jnp.maximum(
        jnp.dot(x2.astype(jnp.bfloat16), w2.astype(jnp.bfloat16),
                preferred_element_type=jnp.float32) + b2, 0.0)
    assert jnp.allclose(out2, ref2, atol=1e-2, rtol=1e-2)

    # --- Case 3: multi-K accumulator path with K padding (H=200, tk=128) ----
    B3, H3, O3 = 64, 200, 256
    x3 = jax.random.normal(ks[6], (B3, H3), dtype=jnp.float32)
    w3 = jax.random.normal(ks[7], (H3, O3), dtype=jnp.float32) * 0.05
    b3 = jax.random.normal(ks[8], (O3,), dtype=jnp.float32) * 0.05

    wp3, bp3, tk3 = prepare_decoder_weights(w3, b3, tk=128)  # Kp=256, 2 K steps
    out3 = jax.block_until_ready(decoder_block_apply(x3, wp3, bp3, tk3))
    assert out3.shape == (B3, O3)
    ref3 = jnp.maximum(
        jnp.dot(x3.astype(jnp.bfloat16), w3.astype(jnp.bfloat16),
                preferred_element_type=jnp.float32) + b3, 0.0)
    assert jnp.allclose(out3, ref3, atol=1e-2, rtol=1e-2)

    print("KERNEL_OK")
</pallas_src>

<mosaic_0001>
module attributes {stable_mosaic.version = 11 : i64} {
  func.func @_decoder_kernel_single_k(%arg0: i32, %arg1: i32, %arg2: memref<16x32xbf16, #tpu.memory_space<vmem>>, %arg3: memref<32x128xbf16, #tpu.memory_space<vmem>>, %arg4: memref<1x128xf32, #tpu.memory_space<vmem>>, %arg5: memref<16x128xf32, #tpu.memory_space<vmem>>) attributes {dimension_semantics = [#tpu.dimension_semantics<parallel>, #tpu.dimension_semantics<parallel>], iteration_bounds = array<i64: 1, 1>, scalar_prefetch = 0 : i64, scratch_operands = 0 : i64, tpu.core_type = #tpu.core_type<tc>, window_params = [{transform_indices = @transform_0, window_bounds = array<i64: 16, 32>}, {transform_indices = @transform_1, window_bounds = array<i64: 32, 128>}, {transform_indices = @transform_2, window_bounds = array<i64: 1, 128>}, {transform_indices = @transform_3, window_bounds = array<i64: 16, 128>}]} {
    %c0 = arith.constant 0 : index
    %c0_0 = arith.constant 0 : index
    %0 = vector.load %arg2[%c0, %c0_0] : memref<16x32xbf16, #tpu.memory_space<vmem>>, vector<16x32xbf16>
    %c0_1 = arith.constant 0 : index
    %c0_2 = arith.constant 0 : index
    %1 = vector.load %arg3[%c0_1, %c0_2] : memref<32x128xbf16, #tpu.memory_space<vmem>>, vector<32x128xbf16>
    %cst = arith.constant dense<0.000000e+00> : vector<16x128xf32>
    %2 = tpu.matmul %0, %1, %cst {dimension_numbers = #tpu.dot_dimension_numbers<[1], [0], [0], [1], [0, 0, 1, 1], [], []>} : vector<16x32xbf16>, vector<32x128xbf16>, vector<16x128xf32> -> vector<16x128xf32>
    %c0_3 = arith.constant 0 : index
    %c0_4 = arith.constant 0 : index
    %3 = vector.load %arg4[%c0_3, %c0_4] : memref<1x128xf32, #tpu.memory_space<vmem>>, vector<1x128xf32>
    %4 = vector.broadcast %3 : vector<1x128xf32> to vector<16x128xf32>
    %5 = arith.addf %2, %4 : vector<16x128xf32>
    %cst_5 = arith.constant 0.000000e+00 : f32
    %6 = vector.broadcast %cst_5 : f32 to vector<16x128xf32>
    %7 = arith.maximumf %5, %6 : vector<16x128xf32>
    %c0_6 = arith.constant 0 : index
    %c0_7 = arith.constant 0 : index
    %8 = vector.load %arg5[%c0_6, %c0_7] : memref<16x128xf32, #tpu.memory_space<vmem>>, vector<16x128xf32>
    tpu.vector_store %arg5[%c0_6, %c0_7], %7 {strides = array<i32>} : memref<16x128xf32, #tpu.memory_space<vmem>>, vector<16x128xf32>,
    return
  }
  func.func @transform_0(%arg0: i32, %arg1: i32) -> (i32, i32) {
    %c0_i32 = arith.constant 0 : i32
    %c0_i32_0 = arith.constant 0 : i32
    return %arg0, %c0_i32 : i32, i32
  }
  func.func @transform_1(%arg0: i32, %arg1: i32) -> (i32, i32) {
    %c0_i32 = arith.constant 0 : i32
    %c0_i32_0 = arith.constant 0 : i32
    return %c0_i32, %arg1 : i32, i32
  }
  func.func @transform_2(%arg0: i32, %arg1: i32) -> (i32, i32) {
    %c0_i32 = arith.constant 0 : i32
    %c0_i32_0 = arith.constant 0 : i32
    return %c0_i32, %arg1 : i32, i32
  }
  func.func @transform_3(%arg0: i32, %arg1: i32) -> (i32, i32) {
    %c0_i32 = arith.constant 0 : i32
    return %arg0, %arg1 : i32, i32
  }
}

</mosaic_0001>

<bundles_post_ra>
// kernel: tpu_custom_call.1
= control target key start
LH: loop header
LB: loop body
LE: loop exit
PB: predicated region body
PF: predicated region fallthrough
CT: control target
= control target key end

     0   :  { %8 = vsyncpa [#allocation3], 0  ;;  %v157_v1 = vmov 0.0   ;;  %vm158_vm0 = vmmov 0   ;;  %vm46_vm1 = vcmask 261120   ;;  %s197_s0 = inlined_call_operand.vmem [shape: bf16[8,32], index: 0, kind: input, shape index: {}]   ;;  %s198_s1 = inlined_call_operand.vmem [shape: bf16[32,16], index: 1, kind: input, shape index: {}]   ;;  %s199_s2 = inlined_call_operand.vmem [shape: f32[1,16], index: 2, kind: input, shape index: {}]   ;;  %s200_s3 = inlined_call_operand.hbm [shape: f32[8,16], index: 3, kind: output, shape index: {}]  }
   0x1   :  { %v132_v0 = vld [vmem:[%s198_s1 + $0x8] sm:$0xff]   ;;  %119 = vmatprep.subr.bf16.mxu0 %v157_v1  ;;  %v133_v2 = vld [vmem:[%s198_s1] sm:$0xff]   ;;  %123 = vmatprep.mubr.msk.bf16.mxu0 %vm158_vm0, %v157_v1 }
   0x2   :  { %120 = vmatpush3.bf16.msra.mxu0 %v132_v0  ;;  %v134_v3 = vld [vmem:[%s197_s0] sm:$0xff]  }
   0x3   :  { %121 = vmatprep.subr.bf16.mxu0 %v157_v1  ;;  %v111_v4 = vld [vmem:[%s199_s2] ss:$0 sm:$0xff] }
   0x6   :  { %122 = vmatpush3.bf16.msra.mxu0 %v133_v2 }
   0x9   :  { %124 = vmatmul.mubr.msk.bf16.vlgmr.msra.gmra.mxu0 %vm46_vm1, %v134_v3 }
  0xc9   :  { %v84_v5 = vpop.f32.mrf.mxu0 }
  0xca   :  { %v85_v6 = vadd.f32 %v111_v4, %v84_v5 }
  0xcb   :  { %v125_v7 = vpop.f32.mrf.mxu0 }
  0xcc   :  { %v91_v8 = vmax.f32 %v85_v6, 0.0 }
  0xcd   :  { %v87_v9 = vpop.f32.mrf.mxu0 }
  0xce   :  { %93 = vst [vmem:[#allocation2] sm:$0xff] %v91_v8  ;;  %v88_v10 = vadd.f32 %v111_v4, %v87_v9 }
  0xcf   :  { %v126_v11 = vpop.f32.mrf.mxu0 }
  0xd0   :  { %v92_v12 = vmax.f32 %v88_v10, 0.0 }
  0xd2   :  { %94 = vst [vmem:[#allocation2 + $0x8] sm:$0xff] %v92_v12 }
  0xd3   :  { %99 = vsyncadd [#allocation3], 128  ;;  %s159_s1 = smov [#allocation2]  }
  0xd4   :  { %s100_s0 = sshll.u32 %s159_s1, 4  ;;  %s101_s0 = int_to_ptr.vmem [resolvable:$true] %s100_s0 }
  0xd5   :  { %s135_s20 = scalar_lea.vmem %s101_s0, 128  ;;  %s139_s21 = scalar_lea.vmem %s101_s0, 256 }
  0xd6   :  { %p136_p0 = scmp.ne.s32.totalorder %s101_s0, %s135_s20  ;;  %p140_p1 = scmp.lt.s32.totalorder %s101_s0, %s101_s0 }
  0xd7   :  { %p141_p2 = scmp.lt.s32.totalorder %s139_s21, %s135_s20 }
  0xd9   :  { %p142_p3 = por %p141_p2, %p140_p1 }
  0xdb   :  { %p143_p4 = pnand %p142_p3, %p136_p0 }
  0xdd   :  { %146 = shalt.err (!%p143_p4)
}
  0xde   :  { %s160_s2 = smov 128   ;;  %s161_s22 = smov 8  }
  0xdf   :  { %106 = dma.vmem_to_hbm [thread:$0]  %s101_s0, 128, %s200_s3, [#allocation3], %s160_s2, %s160_s2, %s161_s22  }
  0xe0   :  { %155 = dma.done.wait [#allocation3], 256  }
  0xe1   :  { %156 = vsyncadd [#allocation3], 4294967040 }
  0xe2   :  { %110 = vsyncpa [#allocation3], 1 }

</bundles_post_ra>
